<compile_context>
chip_gen: v7x
topology: tpu7x:2x2x1
jax: 0.10.0
libtpu: 0.0.40
codegen_flags: <defaults>
</compile_context>

<pallas_src>
import numpy as np
import jax
import jax.numpy as jnp
from jax.experimental import pallas as pl
from jax.experimental.pallas import tpu as pltpu


def _fnet_mixer_kernel(x_ref, ch_ref, sh_ref, cs_ref, ss_ref, o_ref):
    bt, S, H = x_ref.shape
    th = o_ref.shape[-1]

    # Hidden-dim FFT (real / imag parts). Fold the batch tile into the M
    # dimension: one (bt*S, H) x (H, th) matmul per part.
    x = x_ref[...].reshape(bt * S, H).astype(jnp.bfloat16)
    a = jnp.dot(x, ch_ref[...], preferred_element_type=jnp.float32)   # (bt*S, th)
    b = jnp.dot(x, sh_ref[...], preferred_element_type=jnp.float32)   # (bt*S, th)

    a = a.reshape(bt, S, th).astype(jnp.bfloat16)
    b = b.reshape(bt, S, th).astype(jnp.bfloat16)
    cs = cs_ref[...]
    ss = ss_ref[...]

    # Seq-dim FFT, real part only: Re((Cs - iSs)(A - iB)) = Cs@A - Ss@B.
    # Cs/Ss are symmetric, so no transpose is needed.
    for i in range(bt):                       # bt is a small static constant
        out_i = (jnp.dot(cs, a[i], preferred_element_type=jnp.float32)
                 - jnp.dot(ss, b[i], preferred_element_type=jnp.float32))
        o_ref[i] = out_i.astype(o_ref.dtype)


def _dft_cos_sin(n, dtype):
    idx = np.arange(n)
    theta = 2.0 * np.pi * (np.outer(idx, idx) % n) / n     # exact angles in f64
    return (jnp.asarray(np.cos(theta), dtype=dtype),
            jnp.asarray(np.sin(theta), dtype=dtype))


def _pick_hidden_tile(H):
    # Largest lane-dense (multiple-of-128) tile <= 512 that divides H; else full H.
    for th in (512, 384, 256, 128):
        if H % th == 0:
            return th
    return H


def _pick_batch_tile(B, S, H):
    # Fold batch elements so the hidden-FFT matmul has >= ~256 rows, while
    # keeping the x block small (<= 4 MiB assuming f32 input).
    target = max(1, -(-256 // S))             # ceil(256 / S)
    bt = 1
    for cand in range(1, B + 1):
        if B % cand == 0 and cand <= target and cand * S * H * 4 <= (4 << 20):
            bt = cand
    return bt


def fnet_token_mixer(x):
    """x: (B, S, H) real array -> Re(fft_seq(fft_hidden(x))), same shape/dtype."""
    B, S, H = x.shape
    th = _pick_hidden_tile(H)
    bt = _pick_batch_tile(B, S, H)

    # bf16 twiddles: native-rate MXU inputs; accumulation stays f32 in-kernel.
    ch, sh = _dft_cos_sin(H, jnp.bfloat16)   # (H, H)
    cs, ss = _dft_cos_sin(S, jnp.bfloat16)   # (S, S)

    call = pl.pallas_call(
        _fnet_mixer_kernel,
        out_shape=jax.ShapeDtypeStruct((B, S, H), x.dtype),
        grid_spec=pltpu.PrefetchScalarGridSpec(
            num_scalar_prefetch=0,
            grid=(B // bt, H // th),
            in_specs=[
                pl.BlockSpec((bt, S, H), lambda b, h: (b, 0, 0)),   # x
                pl.BlockSpec((H, th), lambda b, h: (0, h)),         # Ch
                pl.BlockSpec((H, th), lambda b, h: (0, h)),         # Sh
                pl.BlockSpec((S, S), lambda b, h: (0, 0)),          # Cs
                pl.BlockSpec((S, S), lambda b, h: (0, 0)),          # Ss
            ],
            out_specs=pl.BlockSpec((bt, S, th), lambda b, h: (b, 0, h)),
        ),
        compiler_params=pltpu.CompilerParams(
            dimension_semantics=("parallel", "parallel"),
            vmem_limit_bytes=48 * 1024 * 1024,
        ),
    )
    return call(x, ch, sh, cs, ss)


if __name__ == "__main__":
    key = jax.random.PRNGKey(0)
    B, S, H = 2, 8, 32
    x = jax.random.normal(key, (B, S, H), dtype=jnp.float32)

    out = jax.block_until_ready(fnet_token_mixer(x))

    # Reference: fft over hidden (axis=-1) then over seq (axis=-2), real part.
    ref = jnp.real(jnp.fft.fft(jnp.fft.fft(x, axis=-1), axis=-2)).astype(jnp.float32)
    assert out.shape == (B, S, H)
    max_err = float(jnp.max(jnp.abs(out.astype(jnp.float32) - ref)))
    scale = float(jnp.max(jnp.abs(ref)))
    # bf16 MXU inputs with f32 accumulation: allow ~3% of the output scale.
    assert max_err <= 3e-2 * scale + 1e-3, f"mismatch vs FFT reference: {max_err}"

    print("KERNEL_OK")
</pallas_src>

<mosaic_0001>
module attributes {stable_mosaic.version = 11 : i64} {
  func.func @_fnet_mixer_kernel(%arg0: i32, %arg1: i32, %arg2: memref<2x8x32xf32, #tpu.memory_space<vmem>>, %arg3: memref<32x32xbf16, #tpu.memory_space<vmem>>, %arg4: memref<32x32xbf16, #tpu.memory_space<vmem>>, %arg5: memref<8x8xbf16, #tpu.memory_space<vmem>>, %arg6: memref<8x8xbf16, #tpu.memory_space<vmem>>, %arg7: memref<2x8x32xf32, #tpu.memory_space<vmem>>) attributes {dimension_semantics = [#tpu.dimension_semantics<parallel>, #tpu.dimension_semantics<parallel>], iteration_bounds = array<i64: 1, 1>, scalar_prefetch = 0 : i64, scratch_operands = 0 : i64, tpu.core_type = #tpu.core_type<tc>, window_params = [{transform_indices = @transform_0, window_bounds = array<i64: 2, 8, 32>}, {transform_indices = @transform_1, window_bounds = array<i64: 32, 32>}, {transform_indices = @transform_2, window_bounds = array<i64: 32, 32>}, {pipeline_mode = #tpu.pipeline_mode<synchronous>, transform_indices = @transform_3, window_bounds = array<i64: 8, 8>}, {pipeline_mode = #tpu.pipeline_mode<synchronous>, transform_indices = @transform_4, window_bounds = array<i64: 8, 8>}, {transform_indices = @transform_5, window_bounds = array<i64: 2, 8, 32>}]} {
    %c0 = arith.constant 0 : index
    %c0_0 = arith.constant 0 : index
    %c0_1 = arith.constant 0 : index
    %0 = vector.load %arg2[%c0, %c0_0, %c0_1] : memref<2x8x32xf32, #tpu.memory_space<vmem>>, vector<2x8x32xf32>
    %1 = vector.shape_cast %0 : vector<2x8x32xf32> to vector<16x32xf32>
    %2 = arith.truncf %1 : vector<16x32xf32> to vector<16x32xbf16>
    %c0_2 = arith.constant 0 : index
    %c0_3 = arith.constant 0 : index
    %3 = vector.load %arg3[%c0_2, %c0_3] : memref<32x32xbf16, #tpu.memory_space<vmem>>, vector<32x32xbf16>
    %cst = arith.constant dense<0.000000e+00> : vector<16x32xf32>
    %4 = tpu.matmul %2, %3, %cst {dimension_numbers = #tpu.dot_dimension_numbers<[1], [0], [0], [1], [0, 0, 1, 1], [], []>} : vector<16x32xbf16>, vector<32x32xbf16>, vector<16x32xf32> -> vector<16x32xf32>
    %c0_4 = arith.constant 0 : index
    %c0_5 = arith.constant 0 : index
    %5 = vector.load %arg4[%c0_4, %c0_5] : memref<32x32xbf16, #tpu.memory_space<vmem>>, vector<32x32xbf16>
    %cst_6 = arith.constant dense<0.000000e+00> : vector<16x32xf32>
    %6 = tpu.matmul %2, %5, %cst_6 {dimension_numbers = #tpu.dot_dimension_numbers<[1], [0], [0], [1], [0, 0, 1, 1], [], []>} : vector<16x32xbf16>, vector<32x32xbf16>, vector<16x32xf32> -> vector<16x32xf32>
    %7 = vector.shape_cast %4 : vector<16x32xf32> to vector<2x8x32xf32>
    %8 = arith.truncf %7 : vector<2x8x32xf32> to vector<2x8x32xbf16>
    %9 = vector.shape_cast %6 : vector<16x32xf32> to vector<2x8x32xf32>
    %10 = arith.truncf %9 : vector<2x8x32xf32> to vector<2x8x32xbf16>
    %c0_7 = arith.constant 0 : index
    %c0_8 = arith.constant 0 : index
    %11 = vector.load %arg5[%c0_7, %c0_8] : memref<8x8xbf16, #tpu.memory_space<vmem>>, vector<8x8xbf16>
    %c0_9 = arith.constant 0 : index
    %c0_10 = arith.constant 0 : index
    %12 = vector.load %arg6[%c0_9, %c0_10] : memref<8x8xbf16, #tpu.memory_space<vmem>>, vector<8x8xbf16>
    %13 = vector.extract_strided_slice %8 {offsets = [0, 0, 0], sizes = [1, 8, 32], strides = [1, 1, 1]} : vector<2x8x32xbf16> to vector<1x8x32xbf16>
    %14 = vector.shape_cast %13 : vector<1x8x32xbf16> to vector<8x32xbf16>
    %cst_11 = arith.constant dense<0.000000e+00> : vector<8x32xf32>
    %15 = tpu.matmul %11, %14, %cst_11 {dimension_numbers = #tpu.dot_dimension_numbers<[1], [0], [0], [1], [0, 0, 1, 1], [], []>} : vector<8x8xbf16>, vector<8x32xbf16>, vector<8x32xf32> -> vector<8x32xf32>
    %16 = vector.extract_strided_slice %10 {offsets = [0, 0, 0], sizes = [1, 8, 32], strides = [1, 1, 1]} : vector<2x8x32xbf16> to vector<1x8x32xbf16>
    %17 = vector.shape_cast %16 : vector<1x8x32xbf16> to vector<8x32xbf16>
    %cst_12 = arith.constant dense<0.000000e+00> : vector<8x32xf32>
    %18 = tpu.matmul %12, %17, %cst_12 {dimension_numbers = #tpu.dot_dimension_numbers<[1], [0], [0], [1], [0, 0, 1, 1], [], []>} : vector<8x8xbf16>, vector<8x32xbf16>, vector<8x32xf32> -> vector<8x32xf32>
    %19 = arith.subf %15, %18 : vector<8x32xf32>
    %c0_13 = arith.constant 0 : index
    %c0_14 = arith.constant 0 : index
    %c0_15 = arith.constant 0 : index
    %20 = vector.load %arg7[%c0_13, %c0_14, %c0_15] : memref<2x8x32xf32, #tpu.memory_space<vmem>>, vector<1x8x32xf32>
    %21 = vector.shape_cast %20 : vector<1x8x32xf32> to vector<8x32xf32>
    %22 = vector.shape_cast %19 : vector<8x32xf32> to vector<1x8x32xf32>
    tpu.vector_store %arg7[%c0_13, %c0_14, %c0_15], %22 {strides = array<i32>} : memref<2x8x32xf32, #tpu.memory_space<vmem>>, vector<1x8x32xf32>,
    %23 = vector.extract_strided_slice %8 {offsets = [1, 0, 0], sizes = [1, 8, 32], strides = [1, 1, 1]} : vector<2x8x32xbf16> to vector<1x8x32xbf16>
    %24 = vector.shape_cast %23 : vector<1x8x32xbf16> to vector<8x32xbf16>
    %cst_16 = arith.constant dense<0.000000e+00> : vector<8x32xf32>
    %25 = tpu.matmul %11, %24, %cst_16 {dimension_numbers = #tpu.dot_dimension_numbers<[1], [0], [0], [1], [0, 0, 1, 1], [], []>} : vector<8x8xbf16>, vector<8x32xbf16>, vector<8x32xf32> -> vector<8x32xf32>
    %26 = vector.extract_strided_slice %10 {offsets = [1, 0, 0], sizes = [1, 8, 32], strides = [1, 1, 1]} : vector<2x8x32xbf16> to vector<1x8x32xbf16>
    %27 = vector.shape_cast %26 : vector<1x8x32xbf16> to vector<8x32xbf16>
    %cst_17 = arith.constant dense<0.000000e+00> : vector<8x32xf32>
    %28 = tpu.matmul %12, %27, %cst_17 {dimension_numbers = #tpu.dot_dimension_numbers<[1], [0], [0], [1], [0, 0, 1, 1], [], []>} : vector<8x8xbf16>, vector<8x32xbf16>, vector<8x32xf32> -> vector<8x32xf32>
    %29 = arith.subf %25, %28 : vector<8x32xf32>
    %c1 = arith.constant 1 : index
    %c0_18 = arith.constant 0 : index
    %c0_19 = arith.constant 0 : index
    %30 = vector.load %arg7[%c1, %c0_18, %c0_19] : memref<2x8x32xf32, #tpu.memory_space<vmem>>, vector<1x8x32xf32>
    %31 = vector.shape_cast %30 : vector<1x8x32xf32> to vector<8x32xf32>
    %32 = vector.shape_cast %29 : vector<8x32xf32> to vector<1x8x32xf32>
    tpu.vector_store %arg7[%c1, %c0_18, %c0_19], %32 {strides = array<i32>} : memref<2x8x32xf32, #tpu.memory_space<vmem>>, vector<1x8x32xf32>,
    return
  }
  func.func @transform_0(%arg0: i32, %arg1: i32) -> (i32, i32, i32) {
    %c0_i32 = arith.constant 0 : i32
    %c0_i32_0 = arith.constant 0 : i32
    %c0_i32_1 = arith.constant 0 : i32
    return %arg0, %c0_i32, %c0_i32_0 : i32, i32, i32
  }
  func.func @transform_1(%arg0: i32, %arg1: i32) -> (i32, i32) {
    %c0_i32 = arith.constant 0 : i32
    %c0_i32_0 = arith.constant 0 : i32
    return %c0_i32, %arg1 : i32, i32
  }
  func.func @transform_2(%arg0: i32, %arg1: i32) -> (i32, i32) {
    %c0_i32 = arith.constant 0 : i32
    %c0_i32_0 = arith.constant 0 : i32
    return %c0_i32, %arg1 : i32, i32
  }
  func.func @transform_3(%arg0: i32, %arg1: i32) -> (i32, i32) {
    %c0_i32 = arith.constant 0 : i32
    %c0_i32_0 = arith.constant 0 : i32
    %c0_i32_1 = arith.constant 0 : i32
    return %c0_i32, %c0_i32_0 : i32, i32
  }
  func.func @transform_4(%arg0: i32, %arg1: i32) -> (i32, i32) {
    %c0_i32 = arith.constant 0 : i32
    %c0_i32_0 = arith.constant 0 : i32
    %c0_i32_1 = arith.constant 0 : i32
    return %c0_i32, %c0_i32_0 : i32, i32
  }
  func.func @transform_5(%arg0: i32, %arg1: i32) -> (i32, i32, i32) {
    %c0_i32 = arith.constant 0 : i32
    %c0_i32_0 = arith.constant 0 : i32
    return %arg0, %c0_i32, %arg1 : i32, i32, i32
  }
}

</mosaic_0001>

<bundles_post_ra>
// kernel: tpu_custom_call.1
= control target key start
LH: loop header
LB: loop body
LE: loop exit
PB: predicated region body
PF: predicated region fallthrough
CT: control target
= control target key end

     0   :  { %10 = vsyncpa [#allocation3], 0  ;;  %s685_s0 = inlined_call_operand.hbm [shape: f32[2,8,32], index: 0, kind: input, shape index: {}]   ;;  %s686_s1 = inlined_call_operand.hbm [shape: bf16[32,32], index: 1, kind: input, shape index: {}]   ;;  %s687_s2 = inlined_call_operand.hbm [shape: bf16[32,32], index: 2, kind: input, shape index: {}]   ;;  %s688_s3 = inlined_call_operand.vmem [shape: bf16[8,8], index: 3, kind: input, shape index: {}]   ;;  %s689_s4 = inlined_call_operand.vmem [shape: bf16[8,8], index: 4, kind: input, shape index: {}]   ;;  %s690_s5 = inlined_call_operand.hbm [shape: f32[2,8,32], index: 5, kind: output, shape index: {}]  }
   0x1   :  { %11 = vsyncpa [#allocation6], 0 }
   0x2   :  { %12 = vsyncpa [#allocation4], 0  ;;  %s565_s18 = smov [#allocation5]   ;;  %s471_s22 = scalar_lea.hbm %s686_s1, 256 }
   0x3   :  { %s30_s19 = sshll.u32 %s565_s18, 4  ;;  %p472_p0 = scmp.ne.s32.totalorder %s686_s1, %s471_s22  ;;  %s31_s19 = int_to_ptr.vmem [resolvable:$true] %s30_s19 }
   0x4   :  { %p475_p1 = scmp.lt.u32.totalorder %s471_s22, %s686_s1 }
   0x6   :  { %p477_p2 = pnand %p475_p1, %p472_p0 }
   0x8   :  { %480 = shalt.err (!%p477_p2)
}
   0x9   :  { %s481_s27 = scalar_lea.vmem %s31_s19, 256  ;;  %p486_p4 = scmp.lt.s32.totalorder %s31_s19, %s31_s19 }
   0xa   :  { %p482_p3 = scmp.ne.s32.totalorder %s31_s19, %s481_s27  ;;  %p487_p5 = scmp.lt.s32.totalorder %s481_s27, %s481_s27 }
   0xc   :  { %p488_p6 = por %p487_p5, %p486_p4 }
   0xe   :  { %p489_p7 = pnand %p488_p6, %p482_p3 }
  0x10   :  { %492 = shalt.err (!%p489_p7)
}
  0x11   :  { %s566_s28 = smov 64   ;;  %s567_s29 = smov 4  }
  0x12   :  { %36 = dma.hbm_to_vmem [thread:$0]  %s686_s1, 256, %s31_s19, [#allocation6], %s566_s28, %s566_s28, %s567_s29  }
  0x13   :  { %s568_s7 = smov [#allocation2]   ;;  %s493_s11 = scalar_lea.hbm %s685_s0, 256 }
  0x14   :  { %s18_s8 = sshll.u32 %s568_s7, 4  ;;  %p494_p8 = scmp.ne.s32.totalorder %s685_s0, %s493_s11  ;;  %s19_s8 = int_to_ptr.vmem [resolvable:$true] %s18_s8 }
  0x15   :  { %p497_p9 = scmp.lt.u32.totalorder %s493_s11, %s685_s0 }
  0x17   :  { %p499_p10 = pnand %p497_p9, %p494_p8 }
  0x19   :  { %502 = shalt.err (!%p499_p10)
}
  0x1a   :  { %s503_s16 = scalar_lea.vmem %s19_s8, 256  ;;  %p508_p12 = scmp.lt.s32.totalorder %s19_s8, %s19_s8 }
  0x1b   :  { %p504_p11 = scmp.ne.s32.totalorder %s19_s8, %s503_s16  ;;  %p509_p13 = scmp.lt.s32.totalorder %s503_s16, %s503_s16 }
  0x1d   :  { %p510_p0 = por %p509_p13, %p508_p12 }
  0x1f   :  { %p511_p1 = pnand %p510_p0, %p504_p11 }
  0x21   :  { %514 = shalt.err (!%p511_p1)
}
  0x22   :  { %s569_s1 = smov 128   ;;  %s570_s17 = smov 8  }
  0x23   :  { %24 = dma.hbm_to_vmem [thread:$0]  %s685_s0, 256, %s19_s8, [#allocation3], %s569_s1, %s569_s1, %s570_s17  }
  0x24   :  { %s571_s20 = smov [#allocation7]   ;;  %s515_s24 = scalar_lea.hbm %s687_s2, 256 }
  0x25   :  { %s42_s21 = sshll.u32 %s571_s20, 4  ;;  %p516_p2 = scmp.ne.s32.totalorder %s687_s2, %s515_s24  ;;  %s43_s21 = int_to_ptr.vmem [resolvable:$true] %s42_s21 }
  0x26   :  { %p519_p3 = scmp.lt.u32.totalorder %s515_s24, %s687_s2 }
  0x28   :  { %p521_p4 = pnand %p519_p3, %p516_p2 }
  0x2a   :  { %524 = shalt.err (!%p521_p4)
}
  0x2b   :  { %s525_s6 = scalar_lea.vmem %s43_s21, 256  ;;  %p530_p6 = scmp.lt.s32.totalorder %s43_s21, %s43_s21 }
  0x2c   :  { %p526_p5 = scmp.ne.s32.totalorder %s43_s21, %s525_s6  ;;  %p531_p7 = scmp.lt.s32.totalorder %s525_s6, %s525_s6 }
  0x2e   :  { %p532_p8 = por %p531_p7, %p530_p6 }
  0x30   :  { %p533_p9 = pnand %p532_p8, %p526_p5 }
  0x32   :  { %536 = shalt.err (!%p533_p9)
}
  0x33   :  { %48 = dma.hbm_to_vmem [thread:$0]  %s687_s2, 256, %s43_s21, [#allocation6], %s566_s28, %s566_s28, %s567_s29  }
  0x34   :  { %559 = dma.done.wait [#allocation3], 256  }
  0x35   :  { %560 = vsyncadd [#allocation3], 4294967040 }
  0x36   :  { %561 = dma.done.wait [#allocation6], 512  }
  0x37   :  { %562 = vsyncadd [#allocation6], 4294966784  ;;  %v572_v0 = vmov 0.0   ;;  %vm573_vm0 = vmmov 0   ;;  %v467_v1 = vld [vmem:[#allocation5] sm:$0xff]   ;;  %v468_v2 = vld [vmem:[#allocation7] sm:$0xff]  }
  0x38   :  { %417 = vmatprep.subr.bf16.mxu0 %v572_v0  ;;  %425 = vmatprep.subr.bf16.mxu1 %v572_v0  ;;  %v469_v3 = vld [vmem:[#allocation5 + $0x8] sm:$0xff]   ;;  %v470_v4 = vld [vmem:[#allocation7 + $0x8] sm:$0xff]   ;;  %v63_v5 = vld [vmem:[#allocation2] sm:$0xff]  ;;  %vm82_vm1 = vcmask 261120   ;;  %vm194_vm2 = vcmask 1043456   ;;  %vm190_vm3 = vcmask 64512  }
  0x39   :  { %421 = vmatprep.mubr.msk.bf16.mxu0 %vm573_vm0, %v572_v0  ;;  %429 = vmatprep.mubr.msk.bf16.mxu1 %vm573_vm0, %v572_v0  ;;  %v64_v6 = vld [vmem:[#allocation2 + $0x8] sm:$0xff]  ;;  %v188_v22 = vld [vmem:[%s688_s3] sm:$0xf]  ;;  %s574_s3 = smov [#allocation8]  }
  0x3a   :  { %418 = vmatpush3.bf16.msra.mxu0 %v467_v1  ;;  %426 = vmatpush3.bf16.msra.mxu1 %v468_v2  ;;  %v65_v7 = vpack.c.bf16 %v64_v6, %v63_v5  ;;  %v189_v23 = vld [vmem:[%s689_s4] sm:$0xf]  ;;  %s380_s4 = sshll.u32 %s574_s3, 4  ;;  %s381_s4 = int_to_ptr.vmem [resolvable:$true] %s380_s4 }
  0x3b   :  { %419 = vmatprep.subr.bf16.mxu0 %v572_v0  ;;  %427 = vmatprep.subr.bf16.mxu1 %v572_v0  ;;  %s537_s9 = scalar_lea.vmem %s381_s4, 256  ;;  %p542_p11 = scmp.lt.s32.totalorder %s381_s4, %s381_s4 }
  0x3c   :  { %p538_p10 = scmp.ne.s32.totalorder %s381_s4, %s537_s9  ;;  %p543_p12 = scmp.lt.s32.totalorder %s537_s9, %s537_s9 }
  0x3e   :  { %420 = vmatpush3.bf16.msra.mxu0 %v469_v3  ;;  %428 = vmatpush3.bf16.msra.mxu1 %v470_v4  ;;  %p544_p13 = por %p543_p12, %p542_p11 }
  0x3f   :  { %433 = vmatprep.subr.bf16.mxu0 %v572_v0  ;;  %439 = vmatprep.subr.bf16.mxu1 %v572_v0 }
  0x40   :  { %p545_p0 = pnand %p544_p13, %p538_p10 }
  0x41   :  { %422 = vmatmul.mubr.msk.bf16.vlgmr.msra.gmra.mrb[0].mxu0 %vm82_vm1, %v65_v7  ;;  %430 = vmatmul.mubr.msk.bf16.vlgmr.msra.gmra.mrb[0].mxu1 %vm82_vm1, %v65_v7 }
  0x42   :  { %435 = vmatprep.mubr.msk.bf16.mxu0 %vm573_vm0, %v572_v0  ;;  %441 = vmatprep.mubr.msk.bf16.mxu1 %vm573_vm0, %v572_v0 }
 0x114   :  { %v120_v8 = vpop.f32.mrb[0].mxu0  ;;  %v177_v10 = vpop.f32.mrb[0].mxu1 }
 0x115   :  { %v184_v9 = vpack.c.bf16 %v120_v8, %v120_v8  ;;  %v423_v11 = vpop.f32.mrb[1].mxu0  ;;  %v186_v12 = vpack.c.bf16 %v177_v10, %v177_v10  ;;  %v431_v13 = vpop.f32.mrb[1].mxu1 }
 0x116   :  { %v123_v14 = vpop.f32.mrb[2].mxu0  ;;  %v180_v17 = vpop.f32.mrb[2].mxu1 }
 0x117   :  { %v196_v15 = vsel %vm194_vm2, %v184_v9, 0  ;;  %v185_v16 = vpack.c.bf16 %v123_v14, %v123_v14  ;;  %v424_v18 = vpop.f32.mrb[3].mxu0  ;;  %v242_v19 = vsel %vm194_vm2, %v186_v12, 0  ;;  %v187_v20 = vpack.c.bf16 %v180_v17, %v180_v17  ;;  %v432_v21 = vpop.f32.mrb[3].mxu1 }
 0x118   :  { %434 = vmatpush3.bf16.msra.mxu0 %v196_v15  ;;  %440 = vmatpush3.bf16.msra.mxu1 %v242_v19 }
 0x119   :  { %445 = vmatprep.subr.bf16.mxu0 %v572_v0  ;;  %451 = vmatprep.subr.bf16.mxu1 %v572_v0  ;;  %v287_v24 = vsel %vm194_vm2, %v185_v16, 0  ;;  %v330_v25 = vsel %vm194_vm2, %v187_v20, 0 }
 0x11b   :  { %436 = vmatmul.mubr.msk.bf16.vlgmr.msra.gmra.mrb[4].mxu0 %vm190_vm3, %v188_v22  ;;  %442 = vmatmul.mubr.msk.bf16.vlgmr.msra.gmra.mrb[4].mxu1 %vm190_vm3, %v189_v23 }
 0x11c   :  { %446 = vmatpush3.bf16.msra.mxu0 %v287_v24  ;;  %452 = vmatpush3.bf16.msra.mxu1 %v330_v25 }
 0x11d   :  { %447 = vmatprep.mubr.msk.bf16.mxu0 %vm573_vm0, %v572_v0  ;;  %453 = vmatprep.mubr.msk.bf16.mxu1 %vm573_vm0, %v572_v0 }
 0x123   :  { %448 = vmatmul.mubr.msk.bf16.vlgmr.msra.gmra.mrb[8].mxu0 %vm190_vm3, %v188_v22  ;;  %454 = vmatmul.mubr.msk.bf16.vlgmr.msra.gmra.mrb[8].mxu1 %vm190_vm3, %v189_v23 }
 0x1ee   :  { %v232_v26 = vpop.f32.mrb[4].mxu0  ;;  %v278_v27 = vpop.f32.mrb[4].mxu1 }
 0x1ef   :  { %v437_v28 = vpop.f32.mrb[5].mxu0  ;;  %v284_v29 = vsub.f32 %v232_v26, %v278_v27  ;;  %v443_v30 = vpop.f32.mrb[5].mxu1 }
 0x1f0   :  { %v235_v31 = vpop.f32.mrb[6].mxu0  ;;  %v281_v32 = vpop.f32.mrb[6].mxu1 }
 0x1f1   :  { %v438_v33 = vpop.f32.mrb[7].mxu0  ;;  %285 = vst.msk [vmem:[#allocation8] sm:$0xff] %vm82_vm1, %v284_v29  ;;  %v444_v34 = vpop.f32.mrb[7].mxu1 }
 0x1f6   :  { %v323_v35 = vpop.f32.mrb[8].mxu0  ;;  %v366_v36 = vpop.f32.mrb[8].mxu1 }
 0x1f7   :  { %v449_v37 = vpop.f32.mrb[9].mxu0  ;;  %v372_v38 = vsub.f32 %v323_v35, %v366_v36  ;;  %v455_v39 = vpop.f32.mrb[9].mxu1 }
 0x1f8   :  { %v326_v40 = vpop.f32.mrb[10].mxu0  ;;  %v369_v41 = vpop.f32.mrb[10].mxu1 }
 0x1f9   :  { %v450_v42 = vpop.f32.mrb[11].mxu0  ;;  %374 = vst.msk [vmem:[#allocation8 + $0x8] sm:$0xff] %vm82_vm1, %v372_v38  ;;  %v456_v43 = vpop.f32.mrb[11].mxu1 }
 0x1fa   :  { %548 = shalt.err (!%p545_p0)
}
 0x1fb   :  { %s549_s12 = scalar_lea.hbm %s690_s5, 256 }
 0x1fc   :  { %p550_p1 = scmp.ne.s32.totalorder %s690_s5, %s549_s12  ;;  %p553_p2 = scmp.lt.u32.totalorder %s549_s12, %s690_s5 }
 0x1fe   :  { %p555_p3 = pnand %p553_p2, %p550_p1 }
 0x200   :  { %558 = shalt.err (!%p555_p3)
}
 0x201   :  { %386 = dma.vmem_to_hbm [thread:$0]  %s381_s4, 256, %s690_s5, [#allocation4], %s569_s1, %s569_s1, %s570_s17  }
 0x202   :  { %563 = dma.done.wait [#allocation4], 256  }
 0x203   :  { %564 = vsyncadd [#allocation4], 4294967040 }
 0x204   :  { %390 = vsyncpa [#allocation3], 1 }
 0x205   :  { %391 = vsyncpa [#allocation6], 1 }
 0x206   :  { %392 = vsyncpa [#allocation4], 1 }

</bundles_post_ra>
